<compile_context>
chip_gen: v5e
topology: v5e:2x2
jax: 0.10.0
libtpu: 0.0.40
codegen_flags: <defaults>
</compile_context>

<pallas_src>
import jax
import jax.numpy as jnp
from jax.experimental import pallas as pl
from jax.experimental.pallas import tpu as pltpu


def _downsample_kernel(x_ref, w_ref, b_ref, o_ref):
    # x_ref: (TM, s*D)   w_ref: (s*D, D)   b_ref: (1, D)   o_ref: (TM, D)
    y = jnp.dot(x_ref[...], w_ref[...], preferred_element_type=jnp.float32)
    y = y + b_ref[...].astype(jnp.float32)      # broadcast bias over rows
    o_ref[...] = y.astype(o_ref.dtype)


def _pick_row_tile(n):
    """Largest MXU-friendly row tile that divides n (full n as fallback)."""
    for t in (512, 256, 128, 64, 32, 16, 8):
        if t <= n and n % t == 0:
            return t
    return n


def _vmem_budget_bytes(tm, d, ds, in_dtype, out_dtype):
    ib = jnp.dtype(in_dtype).itemsize
    ob = jnp.dtype(out_dtype).itemsize
    need = (
        2 * tm * ds * ib        # x tile, double-buffered by the pipeline
        + 2 * tm * d * ob       # out tile, double-buffered
        + ds * d * ib           # weight, single-buffered (Buffered(1))
        + 8 * max(d, 128) * 4   # bias, padded to an (8,128) tile
    )
    # headroom for compiler scratch; keep within v7x's 64 MiB physical VMEM.
    return int(min(max(int(need * 1.5) + (2 << 20), 16 << 20), 64 << 20))


def linear_downsample(x, weight, bias, shorten_factor, *,
                      compute_dtype=None, row_tile=None, out_dtype=None):
    """x: (B, N*s, D); weight: (s*D, D) (= torch weight.T); bias: (D,).

    Returns (B, N, D), matching
        proj(rearrange(x, 'b (n s) d -> b n (s d)', s=shorten_factor)).
    """
    B, L, D = x.shape
    s = shorten_factor
    assert L % s == 0, "sequence length must be divisible by shorten_factor"
    N = L // s
    Ds = D * s
    assert weight.shape == (Ds, D)
    assert bias.shape == (D,)

    out_dtype = out_dtype if out_dtype is not None else x.dtype

    # Optional low-precision hot path (HBM-bound op -> ~2x fewer bytes).
    if compute_dtype is not None:
        x = x.astype(compute_dtype)
        weight = weight.astype(compute_dtype)

    # 'b (n s) d -> b n (s d)': contiguous row-major regroup -> a free reshape.
    x2 = x.reshape(B, N, Ds)
    bias2 = bias.reshape(1, D)

    TM = row_tile if row_tile is not None else _pick_row_tile(N)
    assert N % TM == 0, "row_tile must divide the downsampled length"
    grid = (B, N // TM)

    vmem_limit = _vmem_budget_bytes(TM, D, Ds, x2.dtype, out_dtype)

    y = pl.pallas_call(
        _downsample_kernel,
        out_shape=jax.ShapeDtypeStruct((B, N, D), out_dtype),
        grid_spec=pltpu.PrefetchScalarGridSpec(
            num_scalar_prefetch=0,
            grid=grid,
            in_specs=[
                # one (TM, s*D) row-tile of one batch element per grid step
                pl.BlockSpec((pl.Squeezed(), TM, Ds), lambda b, i: (b, i, 0)),
                # weight / bias: constant index -> fetched once, single buffer
                pl.BlockSpec((Ds, D), lambda b, i: (0, 0),
                             pipeline_mode=pl.Buffered(1)),
                pl.BlockSpec((1, D), lambda b, i: (0, 0),
                             pipeline_mode=pl.Buffered(1)),
            ],
            out_specs=pl.BlockSpec((pl.Squeezed(), TM, D),
                                   lambda b, i: (b, i, 0)),
        ),
        compiler_params=pltpu.CompilerParams(
            dimension_semantics=("parallel", "parallel"),
            vmem_limit_bytes=vmem_limit,
        ),
    )(x2, weight, bias2)
    return y


if __name__ == "__main__":
    # Small shapes consistent with the module. Note: here D=32 (< 128 lanes)
    # only works because the blocks equal the full array dims; production
    # Conformer dims (D >= 128, multiples of 128) give lane-dense stores.
    B, D = 2, 32
    s = 2
    N = 8                 # downsampled length
    L = N * s             # input sequence length
    Ds = D * s

    key = jax.random.PRNGKey(0)
    kx, kw, kb = jax.random.split(key, 3)

    # Deterministic synthetic parameters (mimicking nn.Linear uniform init).
    bound = 1.0 / (Ds ** 0.5)
    x = jax.random.normal(kx, (B, L, D), dtype=jnp.float32)
    weight = jax.random.uniform(kw, (Ds, D), minval=-bound, maxval=bound,
                                dtype=jnp.float32)   # torch weight, transposed
    bias = jax.random.uniform(kb, (D,), minval=-bound, maxval=bound,
                              dtype=jnp.float32)

    # f32 path — tight correctness check against a pure-JAX reference.
    out = linear_downsample(x, weight, bias, s)
    out = jax.block_until_ready(out)

    x_ref2 = x.reshape(B, N, Ds)                       # 'b (n s) d -> b n (s d)'
    ref = jnp.einsum("bne,ed->bnd", x_ref2, weight) + bias

    assert out.shape == (B, N, D)
    assert jnp.allclose(out, ref, atol=1e-5, rtol=1e-5)

    # bf16 hot path (bandwidth optimization) — loose tolerance vs f32 ref.
    out_bf16 = linear_downsample(x, weight, bias, s,
                                 compute_dtype=jnp.bfloat16)
    out_bf16 = jax.block_until_ready(out_bf16)
    assert out_bf16.shape == (B, N, D)
    assert jnp.allclose(out_bf16.astype(jnp.float32), ref,
                        atol=5e-2, rtol=5e-2)

    print("KERNEL_OK")
</pallas_src>

<mosaic_0001>
module attributes {stable_mosaic.version = 11 : i64} {
  func.func @_downsample_kernel(%arg0: i32, %arg1: i32, %arg2: memref<1x8x64xf32, #tpu.memory_space<vmem>>, %arg3: memref<64x32xf32, #tpu.memory_space<vmem>>, %arg4: memref<1x32xf32, #tpu.memory_space<vmem>>, %arg5: memref<1x8x32xf32, #tpu.memory_space<vmem>>) attributes {dimension_semantics = [#tpu.dimension_semantics<parallel>, #tpu.dimension_semantics<parallel>], iteration_bounds = array<i64: 2, 1>, scalar_prefetch = 0 : i64, scratch_operands = 0 : i64, tpu.core_type = #tpu.core_type<tc>, window_params = [{transform_indices = @transform_0, window_bounds = array<i64: 1, 8, 64>}, {pipeline_mode = #tpu.pipeline_mode<synchronous>, transform_indices = @transform_1, window_bounds = array<i64: 64, 32>}, {pipeline_mode = #tpu.pipeline_mode<synchronous>, transform_indices = @transform_2, window_bounds = array<i64: 1, 32>}, {transform_indices = @transform_3, window_bounds = array<i64: 1, 8, 32>}]} {
    %c0 = arith.constant 0 : index
    %c0_0 = arith.constant 0 : index
    %c0_1 = arith.constant 0 : index
    %0 = vector.load %arg2[%c0, %c0_0, %c0_1] : memref<1x8x64xf32, #tpu.memory_space<vmem>>, vector<1x8x64xf32>
    %1 = vector.shape_cast %0 : vector<1x8x64xf32> to vector<8x64xf32>
    %c0_2 = arith.constant 0 : index
    %c0_3 = arith.constant 0 : index
    %2 = vector.load %arg3[%c0_2, %c0_3] : memref<64x32xf32, #tpu.memory_space<vmem>>, vector<64x32xf32>
    %cst = arith.constant dense<0.000000e+00> : vector<8x32xf32>
    %3 = tpu.matmul %1, %2, %cst {dimension_numbers = #tpu.dot_dimension_numbers<[1], [0], [0], [1], [0, 0, 1, 1], [], []>} : vector<8x64xf32>, vector<64x32xf32>, vector<8x32xf32> -> vector<8x32xf32>
    %c0_4 = arith.constant 0 : index
    %c0_5 = arith.constant 0 : index
    %4 = vector.load %arg4[%c0_4, %c0_5] : memref<1x32xf32, #tpu.memory_space<vmem>>, vector<1x32xf32>
    %5 = vector.broadcast %4 : vector<1x32xf32> to vector<8x32xf32>
    %6 = arith.addf %3, %5 : vector<8x32xf32>
    %c0_6 = arith.constant 0 : index
    %c0_7 = arith.constant 0 : index
    %c0_8 = arith.constant 0 : index
    %7 = vector.load %arg5[%c0_6, %c0_7, %c0_8] : memref<1x8x32xf32, #tpu.memory_space<vmem>>, vector<1x8x32xf32>
    %8 = vector.shape_cast %7 : vector<1x8x32xf32> to vector<8x32xf32>
    %9 = vector.shape_cast %6 : vector<8x32xf32> to vector<1x8x32xf32>
    tpu.vector_store %arg5[%c0_6, %c0_7, %c0_8], %9 {strides = array<i32>} : memref<1x8x32xf32, #tpu.memory_space<vmem>>, vector<1x8x32xf32>,
    return
  }
  func.func @transform_0(%arg0: i32, %arg1: i32) -> (i32, i32, i32) {
    %c0_i32 = arith.constant 0 : i32
    %c0_i32_0 = arith.constant 0 : i32
    return %arg0, %arg1, %c0_i32 : i32, i32, i32
  }
  func.func @transform_1(%arg0: i32, %arg1: i32) -> (i32, i32) {
    %c0_i32 = arith.constant 0 : i32
    %c0_i32_0 = arith.constant 0 : i32
    %c0_i32_1 = arith.constant 0 : i32
    return %c0_i32, %c0_i32_0 : i32, i32
  }
  func.func @transform_2(%arg0: i32, %arg1: i32) -> (i32, i32) {
    %c0_i32 = arith.constant 0 : i32
    %c0_i32_0 = arith.constant 0 : i32
    %c0_i32_1 = arith.constant 0 : i32
    return %c0_i32, %c0_i32_0 : i32, i32
  }
  func.func @transform_3(%arg0: i32, %arg1: i32) -> (i32, i32, i32) {
    %c0_i32 = arith.constant 0 : i32
    %c0_i32_0 = arith.constant 0 : i32
    return %arg0, %arg1, %c0_i32 : i32, i32, i32
  }
}

</mosaic_0001>

<bundles_post_ra>
// kernel: tpu_custom_call.1
= control target key start
LH: loop header
LB: loop body
LE: loop exit
PB: predicated region body
PF: predicated region fallthrough
CT: control target
= control target key end

     0   :  { %8 = vsyncpa [#allocation3], 0  ;;  %s610_s0 = inlined_call_operand.vmem [shape: f32[2,8,64], index: 0, kind: input, shape index: {}]   ;;  %s611_s1 = inlined_call_operand.vmem [shape: f32[64,32], index: 1, kind: input, shape index: {}]   ;;  %s612_s2 = inlined_call_operand.vmem [shape: f32[1,32], index: 2, kind: input, shape index: {}]   ;;  %s613_s3 = inlined_call_operand.hbm [shape: f32[2,8,32], index: 3, kind: output, shape index: {}]  }
   0x1   :  { %10 = vsyncpa [#allocation3 + $0x1], 0  ;;  %s486_s12 = smov 0   ;;  %s488_s13 = smov 0  }
   0x2   :  { %s490_s14 = smov 0   ;;  %s492_s15 = smov 0  }
   0x3   :  { %s494_s16 = smov 0   ;;  %s496_s17 = smov 0  }
   0x4 LB: > { %s318_s18 = sadd.s32 4294967295, %s464_s17   ;;  %s319_s19 = sadd.s32 4294967294, %s464_s17   ;;  %s464_s17 = sphi %s496_s17, %s16_s17   ;;  %s460_s16 = sphi %s494_s16, %s620_s16   ;;  %s456_s15 = sphi %s492_s15, %s619_s15   ;;  %s452_s14 = sphi %s490_s14, %s618_s14   ;;  %s448_s13 = sphi %s488_s13, %s617_s13   ;;  %s444_s12 = sphi %s486_s12, %s616_s12  }
   0x5   : > { %s28_s20 = sadd.s32 1, %s460_s16  ;;  %s107_s21 = sadd.s32 1, %s452_s14 }
   0x6   : > { %p30_p0 = scmp.ge.s32.totalorder %s28_s20, 2  ;;  %p117_p1 = scmp.ne.s32.totalorder %s452_s14, %s448_s13 }
   0x7   : > { %p118_p2 = scmp.eq.s32.totalorder %s318_s18, 1  ;;  %p123_p3 = scmp.ne.s32.totalorder %s448_s13, %s444_s12 }
   0x8   : > { %s622_s20 = smov (%p30_p0, %s28_s20), 0  ;;  %p124_p5 = scmp.eq.s32.totalorder %s319_s19, 1 }
   0x9   : > { %p526_p4 = por %p118_p2, %p117_p1  ;;  %s102_s23 = ssub.s32 %s460_s16, %s622_s20 }
   0xa   : > { %p322_p6 = scmp.ge.s32.totalorder %s464_s17, 1  ;;  %p105_p7 = scmp.eq.s32.totalorder %s102_s23, 0 }
   0xb   : > { %p533_p8 = por %p124_p5, %p123_p3  ;;  %p158_p9 = scmp.lt.s32.totalorder %s464_s17, 3 }
   0xc   : > { %s539_s25 = scalar_select %p105_p7, %s452_s14, %s107_s21  }
   0xd   : > { %p159_p10 = pnand %p322_p6, %p158_p9 }
   0xe   : > { %p184_p11 = scmp.lt.s32.totalorder (!%p159_p10), %s456_s15, 1  ;;  %s181_s30 = sand.u32 (!%p159_p10), 1, %s448_s13  }
   0xf   : > { %162 = sbr.rel (%p159_p10) target bundleno = 167 (0xa7), region = 32  ;;  %s323_s4 = sshll.u32 (!%p159_p10), %s181_s30, 3 }
  0x10   : > { %s231_s21 = scalar_lea.sflag (!%p159_p10), [#allocation3], %s181_s30  ;;  %s406_s28 = scalar_lea.hbm (!%p159_p10), %s613_s3, 16 }
  0x14   : > { %v199_v0 = vld [vmem:[%s611_s1 + $0x38] sm:$0xff]  ;;  %v198_v1 = vld [vmem:[%s611_s1 + $0x30] sm:$0xff]  ;;  %v197_v2 = vld [vmem:[%s611_s1 + $0x28] sm:$0xff]  ;;  %s185_s5 = scalar_select %p184_p11, %s456_s15, 1  ;;  %vm204_vm0 = vcmask 523264   ;;  %vm228_vm1 = vcmask 261120  }
  0x15   : > { %216 = vmatpush.msra.mxu0 %v199_v0  ;;  %v196_v3 = vld [vmem:[%s611_s1 + $0x20] sm:$0xff]  ;;  %v195_v4 = vld [vmem:[%s611_s1 + $0x18] sm:$0xff]  ;;  %v194_v5 = vld [vmem:[%s611_s1 + $0x10] sm:$0xff] }
  0x16   : > { %s324_s10 = sshll.u32 %s185_s5, 3  ;;  %v193_v6 = vld [vmem:[%s611_s1 + $0x8] sm:$0xff]  ;;  %v192_v7 = vld [vmem:[%s611_s1] sm:$0xff]  ;;  %s327_s5 = sshll.u32 %s456_s15, 3 }
  0x17   : > { %217 = vmatpush.msra.mxu0 %v198_v1  ;;  %s190_s27 = scalar_lea.vmem %s610_s0, %s324_s10  ;;  %s242_s8 = scalar_lea.hbm %s613_s3, %s327_s5  ;;  %v385_v9 = vld [vmem:[%s612_s2] ss:$0 sm:$0xff] }
  0x18   : > { %v191_v8 = vld [vmem:[%s190_s27] sm:$0xff]  ;;  %s183_s10 = scalar_lea.vmem [#allocation2], %s323_s4  ;;  %s246_s19 = sshll.u32 %s242_s8, 4  ;;  %s247_s19 = int_to_ptr.hbm [resolvable:$true] %s246_s19 }
  0x19   : > { %218 = vmatpush.msra.mxu0 %v197_v2  ;;  %s244_s18 = sshll.u32 %s183_s10, 4  ;;  %s400_s15 = sshra.s32 %s247_s19, 4  ;;  %s245_s18 = int_to_ptr.vmem [resolvable:$true] %s244_s18  ;;  %s401_s15 = int_to_ptr.hbm [resolvable:$true] %s400_s15 }
  0x1a   : > { %s402_s23 = scalar_lea.hbm %s401_s15, 8  ;;  %p407_p1 = scmp.lt.s32.totalorder %s401_s15, %s613_s3 }
  0x1b   : > { %219 = vmatpush.msra.mxu0 %v196_v3  ;;  %p403_p12 = scmp.ne.s32.totalorder %s401_s15, %s402_s23  ;;  %p408_p2 = scmp.lt.s32.totalorder %s406_s28, %s402_s23 }
  0x1d   : > { %220 = vmatpush.msra.mxu0 %v195_v4  ;;  %p404_p13 = pnand %p403_p12, %p526_p4  ;;  %p409_p3 = por %p408_p2, %p407_p1 }
  0x1f   : > { %221 = vmatpush.msra.mxu0 %v194_v5  ;;  %p405_p0 = pneg %p404_p13 }
  0x21   : > { %222 = vmatpush.msra.mxu0 %v193_v6  ;;  %p410_p5 = pnand %p409_p3, %p405_p0 }
  0x23   : > { %223 = vmatpush.msra.mxu0 %v192_v7 }
  0x24   : > { %325 = vmatmul.msk.f32.vlgmr.msra.gmra.mxu0 %vm204_vm0, %v191_v8 }
  0xa1   : > { %v225_v10 = vpop.f32.mrf.mxu0 }
  0xa2   : > { %v226_v11 = vadd.f32 %v385_v9, %v225_v10 }
  0xa4   : > { %229 = vst.msk [vmem:[%s183_s10] sm:$0xff] %vm228_vm1, %v226_v11 }
  0xa5   : > { %413 = shalt.err (!%p410_p5)
}
  0xa6   : > { %330 = dma.vmem_to_hbm [thread:$0]  (%p526_p4), %s245_s18, 128, %s247_s19, %s231_s21  }
  0xa7 PF: > { %p336_p6 = scmp.ge.s32.totalorder %s464_s17, 2  ;;  %s258_s30 = sand.u32 1, %s444_s12  }
  0xa8   : > { %s259_s5 = scalar_lea.sflag [#allocation3], %s258_s30 }
  0xa9   : > { %p333_p7 = pnand %p336_p6, %p533_p8 }
  0xab   : > { %p334_p9 = pneg %p333_p7 }
  0xad   : > { %439 = dma.done.wait (%p334_p9), %s259_s5, 128  }
  0xae   : > { %441 = vsyncadd (%p334_p9), %s259_s5, 4294967168  ;;  %s16_s17 = sadd.s32 1, %s464_s17   ;;  %s616_s12 = smov %s448_s13 }
  0xaf   : > { %p13_p10 = scmp.ge.s32.totalorder %s16_s17, 4   ;;  %s617_s13 = smov %s452_s14 }
  0xb0   : > { %s618_s14 = smov %s539_s25  ;;  %s619_s15 = smov %s460_s16 }
  0xb1   : > { %s620_s16 = smov %s622_s20  ;;  %15 = sbr.rel (!%p13_p10) target bundleno = 4 (0x4), region = 67 }
  0xb6   :  { %265 = vsyncpa [#allocation3], 1 }
  0xb7   :  { %267 = vsyncpa [#allocation3 + $0x1], 1 }

</bundles_post_ra>
